<compile_context>
chip_gen: v7x
topology: tpu7x:2x2x1
jax: 0.10.0
libtpu: 0.0.40
codegen_flags: <defaults>
</compile_context>

<pallas_src>
import numpy as np
import jax
import jax.numpy as jnp
from jax import lax
from jax.experimental import pallas as pl
from jax.experimental.pallas import tpu as pltpu

LANES = 128
SUBLANES = 8
MAX_TILE_ROWS = 1024    # (1024,128) f32 tile = 512 KiB; 2 inputs x 2 bufs ~ 2 MiB
NUM_CORE_SPLITS = 2     # leading "parallel" grid axis (v7x megacore); harmless on 1-TC chips


def _make_loss_kernel(n_valid, tile_rows, steps_per_split, first_pad_block, has_pad):
    """All args are static Python ints / bools baked into the kernel."""
    tile_elems = tile_rows * LANES
    n_folds = tile_rows // SUBLANES

    def _fold(x):
        # (tile_rows, 128) -> (8, 128): sum groups of 8 sublanes.  The reshape
        # stays (8,128)-tile aligned, so this is n_folds-1 pure VPU vreg adds.
        return jnp.sum(jnp.reshape(x, (n_folds, SUBLANES, LANES)), axis=0)

    def _accumulate(a, f, m, out_ref):
        # actual[(actual <= 0) & (actual > -1)] = -1 only touches negatives,
        # so a_cl == a wherever a > 0 and |(a_cl - f) / a_cl| serves both
        # the positive and negative branches.  a_cl is never 0 -> finite.
        a_cl = jnp.where((a <= 0.0) & (a > -1.0), jnp.float32(-1.0), a)
        # TODO(synk): pl.reciprocal(a_cl, approx=True) saves ~3 VALU ops/elem
        # but its ~1e-4 rel. error erodes accuracy margin vs the f64 reference.
        ratio = jnp.abs((a_cl - f) / a_cl)
        pos = a > 0.0
        ok = (f > 0.0) == pos                    # TP + TN indicator
        if m is None:                            # unmasked fast path
            pos_f = pos.astype(jnp.float32)
            neg_f = 1.0 - pos_f
            ok_f = ok.astype(jnp.float32)
        else:                                    # tail block containing padding
            pos_f = (pos & m).astype(jnp.float32)
            neg_f = (jnp.logical_not(pos) & m).astype(jnp.float32)
            ok_f = (ok & m).astype(jnp.float32)
        out_ref[0] += _fold(ratio * pos_f)       # sum |a - f| / |a|        (positives)
        out_ref[1] += _fold(ratio * neg_f)       # sum |a_cl - f| / |a_cl|  (negatives)
        out_ref[2] += _fold(pos_f)               # n1
        out_ref[3] += _fold(ok_f)                # TP + TN

    def _loss_kernel(a_ref, f_ref, out_ref):
        c = pl.program_id(0)                     # core-slice (parallel)
        k = pl.program_id(1)                     # reduction step (arbitrary)

        @pl.when(k == 0)
        def _init():
            out_ref[...] = jnp.zeros((4, SUBLANES, LANES), jnp.float32)

        a = a_ref[...]
        f = f_ref[...]

        if not has_pad:
            _accumulate(a, f, None, out_ref)
        else:
            blk = c * steps_per_split + k        # global block index

            @pl.when(blk < first_pad_block)      # interior: no invalid elements
            def _fast():
                _accumulate(a, f, None, out_ref)

            @pl.when(blk >= first_pad_block)     # tail: mask out padded elements
            def _tail():
                row = lax.broadcasted_iota(jnp.int32, (tile_rows, LANES), 0)
                col = lax.broadcasted_iota(jnp.int32, (tile_rows, LANES), 1)
                limit = n_valid - blk * tile_elems     # scalar, may be <= 0
                m = (row * LANES + col) < limit
                _accumulate(a, f, m, out_ref)

    return _loss_kernel


def custom_loss(actual, forecast):
    a = jnp.asarray(actual, jnp.float32).reshape(-1)
    f = jnp.asarray(forecast, jnp.float32).reshape(-1)
    n = int(a.shape[0])                          # static at trace time

    rows = max(pl.cdiv(n, LANES), 1)
    rows8 = pl.cdiv(rows, SUBLANES) * SUBLANES   # sublane-align row count
    tile_rows = min(rows8, MAX_TILE_ROWS)
    grid_steps = pl.cdiv(rows8, tile_rows)

    # Split rows across TensorCores only when there is more than one tile.
    splits = NUM_CORE_SPLITS if grid_steps >= NUM_CORE_SPLITS else 1
    steps_per_split = pl.cdiv(grid_steps, splits)
    total_blocks = splits * steps_per_split
    rows_padded = total_blocks * tile_rows
    n_total = rows_padded * LANES
    pad = n_total - n

    if pad:                                      # skip the extra HBM pass when aligned
        a = jnp.pad(a, (0, pad))
        f = jnp.pad(f, (0, pad))
    a2 = a.reshape(rows_padded, LANES)
    f2 = f.reshape(rows_padded, LANES)

    first_pad_block = n // (tile_rows * LANES)   # first block touching padding

    in_spec = pl.BlockSpec((tile_rows, LANES),
                           lambda c, k: (c * steps_per_split + k, 0))
    out_spec = pl.BlockSpec((None, 4, SUBLANES, LANES),
                            lambda c, k: (c, 0, 0, 0))

    partials = pl.pallas_call(
        _make_loss_kernel(n, tile_rows, steps_per_split, first_pad_block, pad > 0),
        out_shape=jax.ShapeDtypeStruct((splits, 4, SUBLANES, LANES), jnp.float32),
        grid=(splits, steps_per_split),
        in_specs=[in_spec, in_spec],
        out_specs=out_spec,
        compiler_params=pltpu.CompilerParams(
            dimension_semantics=("parallel", "arbitrary")),
        cost_estimate=pl.CostEstimate(flops=16 * n_total,
                                      transcendentals=n_total,
                                      bytes_accessed=8 * n_total),
    )(a2, f2)

    # Tiny cross-core / cross-lane combine + final scalar math (negligible XLA ops).
    sums = jnp.sum(partials, axis=(0, 2, 3))     # (4,): s1, s2, n1, correct
    s1, s2, n1, correct = sums[0], sums[1], sums[2], sums[3]
    n2 = jnp.float32(n) - n1                     # positives | negatives == everything
    e1 = s1 / (n1 + 1e-7)
    e2 = s2 / (n2 + 1e-7)
    # Reference divides by n (= TP+TN+FP+FN); guard n == 0 (reference -> NaN).
    accuracy = correct / jnp.float32(max(n, 1))
    e_f = 0.2 * e1 + 0.8 * e2 - (accuracy - 0.95)
    return e_f, accuracy


def _reference(actual, forecast):
    # faithful port of the original numpy calculate_measure (f64)
    actual = np.array(actual, dtype=np.float64)
    forecast = np.array(forecast, dtype=np.float64)
    positive_index = actual > 0
    negative_index = actual <= 0
    actual[(actual <= 0) & (actual > -1)] = -1
    n1 = np.sum(positive_index) + 1e-07
    n2 = np.sum(negative_index) + 1e-07
    e1 = np.sum(np.abs(actual[positive_index] - forecast[positive_index])
                / np.abs(actual[positive_index])) / n1
    e2 = np.sum(np.abs(actual[negative_index] - forecast[negative_index])
                / np.abs(actual[negative_index])) / n2
    TP = np.sum((forecast > 0) & (actual > 0))
    TN = np.sum((forecast <= 0) & (actual <= 0))
    FP = np.sum((forecast > 0) & (actual <= 0))
    FN = np.sum((forecast <= 0) & (actual > 0))
    Accuracy = (TP + TN) / (TP + TN + FP + FN)
    e_F = 0.2 * e1 + 0.8 * e2 - (Accuracy - 0.95)
    return e_F, Accuracy


if __name__ == "__main__":
    key = jax.random.PRNGKey(0)
    k1, k2, k3, k4 = jax.random.split(key, 4)

    # Primary check: module-consistent small NCHW input (2, 4, 16, 16).
    shape = (2, 4, 16, 16)
    actual = jax.random.normal(k1, shape, dtype=jnp.float32)
    forecast = jax.random.normal(k2, shape, dtype=jnp.float32)
    e_f, acc = jax.jit(custom_loss)(actual, forecast)
    jax.block_until_ready((e_f, acc))
    ref_ef, ref_acc = _reference(np.asarray(actual), np.asarray(forecast))
    np.testing.assert_allclose(float(e_f), ref_ef, rtol=1e-3, atol=1e-3)
    np.testing.assert_allclose(float(acc), ref_acc, rtol=1e-6, atol=1e-6)

    # Extra coverage: odd size -> multi-tile grid, core-split + masked-tail paths.
    n_big = 300001
    actual2 = jax.random.normal(k3, (n_big,), dtype=jnp.float32)
    forecast2 = jax.random.normal(k4, (n_big,), dtype=jnp.float32)
    e_f2, acc2 = jax.jit(custom_loss)(actual2, forecast2)
    jax.block_until_ready((e_f2, acc2))
    ref_ef2, ref_acc2 = _reference(np.asarray(actual2), np.asarray(forecast2))
    np.testing.assert_allclose(float(e_f2), ref_ef2, rtol=1e-3, atol=1e-3)
    np.testing.assert_allclose(float(acc2), ref_acc2, rtol=1e-6, atol=1e-6)

    print("KERNEL_OK")
</pallas_src>

<mosaic_0001>
module attributes {stable_mosaic.version = 11 : i64} {
  func.func @_loss_kernel(%arg0: i32, %arg1: i32, %arg2: memref<16x128xf32, #tpu.memory_space<vmem>>, %arg3: memref<16x128xf32, #tpu.memory_space<vmem>>, %arg4: memref<1x4x8x128xf32, #tpu.memory_space<vmem>>) attributes {dimension_semantics = [#tpu.dimension_semantics<parallel>, #tpu.dimension_semantics<arbitrary>], iteration_bounds = array<i64: 1, 1>, scalar_prefetch = 0 : i64, scratch_operands = 0 : i64, tpu.core_type = #tpu.core_type<tc>, window_params = [{transform_indices = @transform_0, window_bounds = array<i64: 16, 128>}, {transform_indices = @transform_1, window_bounds = array<i64: 16, 128>}, {transform_indices = @transform_2, window_bounds = array<i64: 1, 4, 8, 128>}]} {
    %c0_i32 = arith.constant 0 : i32
    %0 = arith.cmpi eq, %arg1, %c0_i32 : i32
    %1 = arith.extui %0 : i1 to i32
    %c0_i32_0 = arith.constant 0 : i32
    %2 = arith.cmpi ne, %1, %c0_i32_0 : i32
    scf.if %2 {
      %cst_43 = arith.constant 0.000000e+00 : f32
      %61 = vector.broadcast %cst_43 : f32 to vector<4x8x128xf32>
      %c0_44 = arith.constant 0 : index
      %c0_45 = arith.constant 0 : index
      %c0_46 = arith.constant 0 : index
      %c0_47 = arith.constant 0 : index
      %62 = vector.load %arg4[%c0_44, %c0_45, %c0_46, %c0_47] : memref<1x4x8x128xf32, #tpu.memory_space<vmem>>, vector<1x4x8x128xf32>
      %63 = vector.shape_cast %62 : vector<1x4x8x128xf32> to vector<4x8x128xf32>
      %64 = vector.shape_cast %61 : vector<4x8x128xf32> to vector<1x4x8x128xf32>
      tpu.vector_store %arg4[%c0_44, %c0_45, %c0_46, %c0_47], %64 {strides = array<i32>} : memref<1x4x8x128xf32, #tpu.memory_space<vmem>>, vector<1x4x8x128xf32>,
    } else {
    }
    %c0 = arith.constant 0 : index
    %c0_1 = arith.constant 0 : index
    %3 = vector.load %arg2[%c0, %c0_1] : memref<16x128xf32, #tpu.memory_space<vmem>>, vector<16x128xf32>
    %c0_2 = arith.constant 0 : index
    %c0_3 = arith.constant 0 : index
    %4 = vector.load %arg3[%c0_2, %c0_3] : memref<16x128xf32, #tpu.memory_space<vmem>>, vector<16x128xf32>
    %cst = arith.constant 0.000000e+00 : f32
    %5 = vector.broadcast %cst : f32 to vector<16x128xf32>
    %6 = arith.cmpf ole, %3, %5 : vector<16x128xf32>
    %cst_4 = arith.constant -1.000000e+00 : f32
    %7 = vector.broadcast %cst_4 : f32 to vector<16x128xf32>
    %8 = arith.cmpf ogt, %3, %7 : vector<16x128xf32>
    %9 = arith.andi %6, %8 : vector<16x128xi1>
    %cst_5 = arith.constant -1.000000e+00 : f32
    %10 = vector.broadcast %cst_5 : f32 to vector<16x128xf32>
    %11 = arith.select %9, %10, %3 : vector<16x128xi1>, vector<16x128xf32>
    %12 = arith.subf %11, %4 : vector<16x128xf32>
    %13 = arith.divf %12, %11 : vector<16x128xf32>
    %14 = math.absf %13 : vector<16x128xf32>
    %cst_6 = arith.constant 0.000000e+00 : f32
    %15 = vector.broadcast %cst_6 : f32 to vector<16x128xf32>
    %16 = arith.cmpf ogt, %3, %15 : vector<16x128xf32>
    %cst_7 = arith.constant 0.000000e+00 : f32
    %17 = vector.broadcast %cst_7 : f32 to vector<16x128xf32>
    %18 = arith.cmpf ogt, %4, %17 : vector<16x128xf32>
    %19 = arith.xori %18, %16 : vector<16x128xi1>
    %cst_8 = arith.constant dense<true> : vector<16x128xi1>
    %20 = arith.xori %19, %cst_8 : vector<16x128xi1>
    %21 = arith.extui %16 : vector<16x128xi1> to vector<16x128xi32>
    %22 = arith.sitofp %21 : vector<16x128xi32> to vector<16x128xf32>
    %cst_9 = arith.constant 1.000000e+00 : f32
    %23 = vector.broadcast %cst_9 : f32 to vector<16x128xf32>
    %24 = arith.subf %23, %22 : vector<16x128xf32>
    %25 = arith.extui %20 : vector<16x128xi1> to vector<16x128xi32>
    %26 = arith.sitofp %25 : vector<16x128xi32> to vector<16x128xf32>
    %c0_10 = arith.constant 0 : index
    %c0_11 = arith.constant 0 : index
    %c0_12 = arith.constant 0 : index
    %c0_13 = arith.constant 0 : index
    %27 = vector.load %arg4[%c0_10, %c0_11, %c0_12, %c0_13] : memref<1x4x8x128xf32, #tpu.memory_space<vmem>>, vector<1x1x8x128xf32>
    %28 = vector.shape_cast %27 : vector<1x1x8x128xf32> to vector<8x128xf32>
    %29 = arith.mulf %14, %22 : vector<16x128xf32>
    %30 = vector.shape_cast %29 : vector<16x128xf32> to vector<2x8x128xf32>
    %cst_14 = arith.constant dense<0.000000e+00> : vector<8x128xf32>
    %31 = vector.multi_reduction <add>, %30, %cst_14 [0] : vector<2x8x128xf32> to vector<8x128xf32>
    %32 = arith.addf %28, %31 : vector<8x128xf32>
    %c0_15 = arith.constant 0 : index
    %c0_16 = arith.constant 0 : index
    %c0_17 = arith.constant 0 : index
    %c0_18 = arith.constant 0 : index
    %33 = vector.load %arg4[%c0_15, %c0_16, %c0_17, %c0_18] : memref<1x4x8x128xf32, #tpu.memory_space<vmem>>, vector<1x1x8x128xf32>
    %34 = vector.shape_cast %33 : vector<1x1x8x128xf32> to vector<8x128xf32>
    %35 = vector.shape_cast %32 : vector<8x128xf32> to vector<1x1x8x128xf32>
    tpu.vector_store %arg4[%c0_15, %c0_16, %c0_17, %c0_18], %35 {strides = array<i32>} : memref<1x4x8x128xf32, #tpu.memory_space<vmem>>, vector<1x1x8x128xf32>,
    %c0_19 = arith.constant 0 : index
    %c1 = arith.constant 1 : index
    %c0_20 = arith.constant 0 : index
    %c0_21 = arith.constant 0 : index
    %36 = vector.load %arg4[%c0_19, %c1, %c0_20, %c0_21] : memref<1x4x8x128xf32, #tpu.memory_space<vmem>>, vector<1x1x8x128xf32>
    %37 = vector.shape_cast %36 : vector<1x1x8x128xf32> to vector<8x128xf32>
    %38 = arith.mulf %14, %24 : vector<16x128xf32>
    %39 = vector.shape_cast %38 : vector<16x128xf32> to vector<2x8x128xf32>
    %cst_22 = arith.constant dense<0.000000e+00> : vector<8x128xf32>
    %40 = vector.multi_reduction <add>, %39, %cst_22 [0] : vector<2x8x128xf32> to vector<8x128xf32>
    %41 = arith.addf %37, %40 : vector<8x128xf32>
    %c0_23 = arith.constant 0 : index
    %c1_24 = arith.constant 1 : index
    %c0_25 = arith.constant 0 : index
    %c0_26 = arith.constant 0 : index
    %42 = vector.load %arg4[%c0_23, %c1_24, %c0_25, %c0_26] : memref<1x4x8x128xf32, #tpu.memory_space<vmem>>, vector<1x1x8x128xf32>
    %43 = vector.shape_cast %42 : vector<1x1x8x128xf32> to vector<8x128xf32>
    %44 = vector.shape_cast %41 : vector<8x128xf32> to vector<1x1x8x128xf32>
    tpu.vector_store %arg4[%c0_23, %c1_24, %c0_25, %c0_26], %44 {strides = array<i32>} : memref<1x4x8x128xf32, #tpu.memory_space<vmem>>, vector<1x1x8x128xf32>,
    %c0_27 = arith.constant 0 : index
    %c2 = arith.constant 2 : index
    %c0_28 = arith.constant 0 : index
    %c0_29 = arith.constant 0 : index
    %45 = vector.load %arg4[%c0_27, %c2, %c0_28, %c0_29] : memref<1x4x8x128xf32, #tpu.memory_space<vmem>>, vector<1x1x8x128xf32>
    %46 = vector.shape_cast %45 : vector<1x1x8x128xf32> to vector<8x128xf32>
    %47 = vector.shape_cast %22 : vector<16x128xf32> to vector<2x8x128xf32>
    %cst_30 = arith.constant dense<0.000000e+00> : vector<8x128xf32>
    %48 = vector.multi_reduction <add>, %47, %cst_30 [0] : vector<2x8x128xf32> to vector<8x128xf32>
    %49 = arith.addf %46, %48 : vector<8x128xf32>
    %c0_31 = arith.constant 0 : index
    %c2_32 = arith.constant 2 : index
    %c0_33 = arith.constant 0 : index
    %c0_34 = arith.constant 0 : index
    %50 = vector.load %arg4[%c0_31, %c2_32, %c0_33, %c0_34] : memref<1x4x8x128xf32, #tpu.memory_space<vmem>>, vector<1x1x8x128xf32>
    %51 = vector.shape_cast %50 : vector<1x1x8x128xf32> to vector<8x128xf32>
    %52 = vector.shape_cast %49 : vector<8x128xf32> to vector<1x1x8x128xf32>
    tpu.vector_store %arg4[%c0_31, %c2_32, %c0_33, %c0_34], %52 {strides = array<i32>} : memref<1x4x8x128xf32, #tpu.memory_space<vmem>>, vector<1x1x8x128xf32>,
    %c0_35 = arith.constant 0 : index
    %c3 = arith.constant 3 : index
    %c0_36 = arith.constant 0 : index
    %c0_37 = arith.constant 0 : index
    %53 = vector.load %arg4[%c0_35, %c3, %c0_36, %c0_37] : memref<1x4x8x128xf32, #tpu.memory_space<vmem>>, vector<1x1x8x128xf32>
    %54 = vector.shape_cast %53 : vector<1x1x8x128xf32> to vector<8x128xf32>
    %55 = vector.shape_cast %26 : vector<16x128xf32> to vector<2x8x128xf32>
    %cst_38 = arith.constant dense<0.000000e+00> : vector<8x128xf32>
    %56 = vector.multi_reduction <add>, %55, %cst_38 [0] : vector<2x8x128xf32> to vector<8x128xf32>
    %57 = arith.addf %54, %56 : vector<8x128xf32>
    %c0_39 = arith.constant 0 : index
    %c3_40 = arith.constant 3 : index
    %c0_41 = arith.constant 0 : index
    %c0_42 = arith.constant 0 : index
    %58 = vector.load %arg4[%c0_39, %c3_40, %c0_41, %c0_42] : memref<1x4x8x128xf32, #tpu.memory_space<vmem>>, vector<1x1x8x128xf32>
    %59 = vector.shape_cast %58 : vector<1x1x8x128xf32> to vector<8x128xf32>
    %60 = vector.shape_cast %57 : vector<8x128xf32> to vector<1x1x8x128xf32>
    tpu.vector_store %arg4[%c0_39, %c3_40, %c0_41, %c0_42], %60 {strides = array<i32>} : memref<1x4x8x128xf32, #tpu.memory_space<vmem>>, vector<1x1x8x128xf32>,
    return
  }
  func.func @transform_0(%arg0: i32, %arg1: i32) -> (i32, i32) {
    %c1_i32 = arith.constant 1 : i32
    %0 = arith.muli %arg0, %c1_i32 : i32
    %1 = arith.addi %0, %arg1 : i32
    %c0_i32 = arith.constant 0 : i32
    %c0_i32_0 = arith.constant 0 : i32
    return %1, %c0_i32 : i32, i32
  }
  func.func @transform_1(%arg0: i32, %arg1: i32) -> (i32, i32) {
    %c1_i32 = arith.constant 1 : i32
    %0 = arith.muli %arg0, %c1_i32 : i32
    %1 = arith.addi %0, %arg1 : i32
    %c0_i32 = arith.constant 0 : i32
    %c0_i32_0 = arith.constant 0 : i32
    return %1, %c0_i32 : i32, i32
  }
  func.func @transform_2(%arg0: i32, %arg1: i32) -> (i32, i32, i32, i32) {
    %c0_i32 = arith.constant 0 : i32
    %c0_i32_0 = arith.constant 0 : i32
    %c0_i32_1 = arith.constant 0 : i32
    %c0_i32_2 = arith.constant 0 : i32
    return %arg0, %c0_i32, %c0_i32_0, %c0_i32_1 : i32, i32, i32, i32
  }
}

</mosaic_0001>

<bundles_post_ra>
// kernel: custom_loss.1
= control target key start
LH: loop header
LB: loop body
LE: loop exit
PB: predicated region body
PF: predicated region fallthrough
CT: control target
= control target key end

     0   :  { %v156_v6 = vmov 0.0   ;;  %vm157_vm12 = vmmov 1   ;;  %s197_s0 = inlined_call_operand.vmem [shape: f32[16,128], index: 0, kind: input, shape index: {}]   ;;  %s198_s1 = inlined_call_operand.vmem [shape: f32[16,128], index: 1, kind: input, shape index: {}]   ;;  %s199_s2 = inlined_call_operand.vmem [shape: f32[1,4,8,128], index: 2, kind: output, shape index: {}]  }
   0x1   :  { %v63_v0 = vld [vmem:[%s197_s0] sm:$0xff]  ;;  %v64_v1 = vld [vmem:[%s197_s0 + $0x8] sm:$0xff] }
   0x2   :  { %v65_v2 = vld [vmem:[%s198_s1] sm:$0xff]  ;;  %v66_v3 = vld [vmem:[%s198_s1 + $0x8] sm:$0xff]  ;;  %vm67_vm0 = vcmp.le.f32.partialorder %v63_v0, 0.0  ;;  %vm68_vm1 = vcmp.le.f32.partialorder %v64_v1, 0.0  ;;  %vm69_vm2 = vcmp.gt.f32.partialorder %v63_v0, -1.0  ;;  %vm70_vm3 = vcmp.gt.f32.partialorder %v64_v1, -1.0 }
   0x3   :  { %vm71_vm4 = vmand %vm67_vm0, %vm69_vm2  ;;  %vm83_vm5 = vcmp.gt.f32.partialorder %v63_v0, 0.0  ;;  %vm84_vm6 = vcmp.gt.f32.partialorder %v64_v1, 0.0  ;;  %vm85_vm7 = vcmp.gt.f32.partialorder %v65_v2, 0.0  ;;  %vm86_vm8 = vcmp.gt.f32.partialorder %v66_v3, 0.0 }
   0x4   :  { %vm72_vm9 = vmand %vm68_vm1, %vm70_vm3  ;;  %v73_v4 = vsel %vm71_vm4, -1.0, %v63_v0  ;;  %v140_v7 = vsel %vm83_vm5, 1.0, %v156_v6  ;;  %v141_v8 = vsel %vm84_vm6, 1.0, %v156_v6 }
   0x5   :  { %v74_v5 = vsel %vm72_vm9, -1.0, %v64_v1  ;;  %152 = vrcp.f32 %v73_v4  ;;  %vm87_vm10 = vmxor %vm85_vm7, %vm83_vm5  ;;  %v116_v9 = vadd.f32 %v141_v8, %v140_v7  ;;  %v75_v13 = vsub.f32 %v73_v4, %v65_v2 }
   0x6   :  { %154 = vrcp.f32 %v74_v5  ;;  %vm88_vm11 = vmxor %vm86_vm8, %vm84_vm6  ;;  %v76_v14 = vsub.f32 %v74_v5, %v66_v3  ;;  %v95_v18 = vsub.f32 1.0, %v140_v7  ;;  %v96_v20 = vsub.f32 1.0, %v141_v8 }
   0x7   :  { %vm89_vm13 = vmxor %vm87_vm10, %vm157_vm12  ;;  %147 = vst [vmem:[%s199_s2 + $0x10] sm:$0xff] %v116_v9 }
   0x8   :  { %vm90_vm14 = vmxor %vm88_vm11, %vm157_vm12  ;;  %v142_v10 = vsel %vm89_vm13, 1.0, %v156_v6 }
   0x9   :  { %v143_v11 = vsel %vm90_vm14, 1.0, %v156_v6 }
   0xa   :  { %v121_v12 = vadd.f32 %v143_v11, %v142_v10 }
   0xc   :  { %149 = vst [vmem:[%s199_s2 + $0x18] sm:$0xff] %v121_v12 }
   0xf   :  { %v153_v15 = vpop.eup %152 }
  0x10   :  { %v155_v16 = vpop.eup %154  ;;  %v78_v17 = vmul.f32 %v153_v15, %v75_v13 }
  0x11   :  { %v80_v19 = vmul.f32 %v155_v16, %v76_v14 }
  0x12   :  { %v81_v21 = vand.u32 2147483647, %v78_v17 }
  0x13   :  { %v82_v22 = vand.u32 2147483647, %v80_v19 }
  0x14   :  { %v102_v23 = vmul.f32 %v140_v7, %v81_v21  ;;  %v109_v24 = vmul.f32 %v95_v18, %v81_v21 }
  0x15   :  { %v103_v25 = vmul.f32 %v141_v8, %v82_v22  ;;  %v110_v26 = vmul.f32 %v96_v20, %v82_v22 }
  0x17   :  { %v104_v27 = vadd.f32 %v103_v25, %v102_v23  ;;  %v111_v28 = vadd.f32 %v110_v26, %v109_v24 }
  0x19   :  { %106 = vst [vmem:[%s199_s2] sm:$0xff] %v104_v27  ;;  %145 = vst [vmem:[%s199_s2 + $0x8] sm:$0xff] %v111_v28 }

</bundles_post_ra>
